<compile_context>
chip_gen: v7x
topology: tpu7x:2x2x1
jax: 0.10.0
libtpu: 0.0.40
codegen_flags: <defaults>
</compile_context>

<pallas_src>
import jax
import jax.numpy as jnp
from jax.experimental import pallas as pl
from jax.experimental.pallas import tpu as pltpu


def _round_up(x, m):
    return ((x + m - 1) // m) * m


def _vmem_budget_bytes():
    """Per-generation VMEM request (leave headroom below physical capacity)."""
    try:
        phys = int(pltpu.get_tpu_info().vmem_capacity_bytes)
        if phys <= 0:
            raise ValueError("bad vmem capacity")
    except Exception:
        phys = 64 * 1024 * 1024  # conservative default (v7x-sized per-core VMEM)
    # ~75% of physical, capped at 96 MiB: 48 MiB on v7x, 96 MiB on v5e/v6e.
    return max(32 * 1024 * 1024, min((phys * 3) // 4, 96 * 1024 * 1024))


def _u_dot_v_kernel(u_ref, v_ref, o_ref, acc_ref):
    # u_ref, v_ref: (dk, tile) tiles -- features on sublanes, edges on lanes.
    # o_ref:        (1, tile) lane-dense per-edge dot products.
    # acc_ref:      (1, tile) f32 accumulator, resident across the D grid axis.
    k = pl.program_id(1)

    @pl.when(k == 0)
    def _init():
        acc_ref[...] = jnp.zeros_like(acc_ref)

    u = u_ref[...].astype(jnp.float32)
    v = v_ref[...].astype(jnp.float32)
    acc_ref[...] += jnp.sum(u * v, axis=0, keepdims=True)  # sublane reduce (VPU/XLU)

    @pl.when(k == pl.num_programs(1) - 1)
    def _finalize():
        o_ref[...] = acc_ref[...].astype(o_ref.dtype)


def dot_decoder(ufeats, ifeats, edge_src, edge_dst):
    """Pallas implementation of DotDecoder.forward (DGL fn.u_dot_v).

    ufeats:   (n_users, D) float  -- user node features
    ifeats:   (n_items, D) float  -- item node features
    edge_src: (n_edges,)  int32   -- per-edge source ('user') node index
    edge_dst: (n_edges,)  int32   -- per-edge destination ('item') node index
    returns:  (n_edges, 1) float  -- per-edge dot product
    """
    n_edges = int(edge_src.shape[0])
    d = int(ufeats.shape[1])
    out_dtype = jnp.promote_types(ufeats.dtype, ifeats.dtype)

    if n_edges == 0:
        return jnp.zeros((0, 1), dtype=out_dtype)

    budget = _vmem_budget_bytes()
    itemsize = jnp.dtype(ufeats.dtype).itemsize

    # ---- Tile sizing -------------------------------------------------------
    d8 = _round_up(d, 8)                 # dense f32 sublanes
    e_min = _round_up(n_edges, 128)      # lane-dense edge extent

    # Edge tile: ~2 MiB of combined input per grid step (>= ~85% of the HBM
    # roofline per measurements), at least 1024 lanes, never more than needed.
    bytes_per_lane = max(2 * d8 * itemsize, 1)
    tile = _round_up(max((2 * 1024 * 1024) // bytes_per_lane, 1024), 128)
    tile = min(tile, e_min)
    # Keep >= 2 edge tiles when there is enough work so v7x's two TensorCores
    # both get a share of the "parallel" edge axis (no-op on 1-TC v5e/v6e).
    if e_min >= 256 and tile >= e_min:
        tile = _round_up(e_min // 2, 128)

    # Feature tile: 2 inputs x 2 pipeline buffers x (dk x tile) must stay well
    # inside the VMEM budget (output + accumulator are small by comparison).
    block_budget = (budget * 3) // 5
    dk_max = block_budget // (2 * 2 * itemsize * tile)
    dk = max(8, min(d8, (dk_max // 8) * 8))
    d_pad = _round_up(d8, dk)
    n_k = d_pad // dk

    n_tiles = pl.cdiv(n_edges, tile)
    e_pad = n_tiles * tile

    # ---- Edge gather, directly into the kernel layout ----------------------
    # Pad the cheap index vectors (not the gathered slabs), transpose/zero-pad
    # only the small node tables, and gather columns so the result is already
    # (d_pad, e_pad): one XLA gather per side, no extra transpose/pad HBM pass.
    src = jnp.pad(edge_src.astype(jnp.int32), (0, e_pad - n_edges))
    dst = jnp.pad(edge_dst.astype(jnp.int32), (0, e_pad - n_edges))
    u_tab = jnp.pad(ufeats.T, ((0, d_pad - d), (0, 0)))   # (d_pad, n_users)
    i_tab = jnp.pad(ifeats.T, ((0, d_pad - d), (0, 0)))   # (d_pad, n_items)
    u_e = jnp.take(u_tab, src, axis=1)                    # (d_pad, e_pad)
    v_e = jnp.take(i_tab, dst, axis=1)                    # (d_pad, e_pad)

    out = pl.pallas_call(
        _u_dot_v_kernel,
        out_shape=jax.ShapeDtypeStruct((1, e_pad), out_dtype),
        grid_spec=pltpu.PrefetchScalarGridSpec(
            num_scalar_prefetch=0,
            grid=(n_tiles, n_k),                  # reduction (D) axis innermost
            in_specs=[
                pl.BlockSpec((dk, tile), lambda i, k: (k, i)),
                pl.BlockSpec((dk, tile), lambda i, k: (k, i)),
            ],
            out_specs=pl.BlockSpec((1, tile), lambda i, k: (0, i)),
            scratch_shapes=[pltpu.VMEM((1, tile), jnp.float32)],
        ),
        compiler_params=pltpu.CompilerParams(
            dimension_semantics=("parallel", "arbitrary"),
            vmem_limit_bytes=budget,
        ),
        cost_estimate=pl.CostEstimate(
            flops=2 * e_pad * d_pad,
            transcendentals=0,
            bytes_accessed=(2 * e_pad * d_pad + e_pad) * itemsize,
        ),
    )(u_e, v_e)

    # (1, e_pad) -> (n_edges, 1)
    return out.reshape(e_pad, 1)[:n_edges]


if __name__ == "__main__":
    key = jax.random.PRNGKey(0)
    k_u, k_i, k_s, k_d = jax.random.split(key, 4)

    n_users, n_items, hidden = 8, 8, 32
    n_edges = 16

    ufeats = jax.random.normal(k_u, (n_users, hidden), dtype=jnp.float32)
    ifeats = jax.random.normal(k_i, (n_items, hidden), dtype=jnp.float32)
    edge_src = jax.random.randint(k_s, (n_edges,), 0, n_users, dtype=jnp.int32)
    edge_dst = jax.random.randint(k_d, (n_edges,), 0, n_items, dtype=jnp.int32)

    pred = dot_decoder(ufeats, ifeats, edge_src, edge_dst)
    pred = jax.block_until_ready(pred)

    # Reference check (pure JAX) of u_dot_v semantics.
    ref = jnp.sum(ufeats[edge_src] * ifeats[edge_dst], axis=-1, keepdims=True)
    assert pred.shape == (n_edges, 1)
    assert jnp.allclose(pred, ref, atol=1e-5, rtol=1e-5)

    print("KERNEL_OK")
</pallas_src>

<mosaic_0001>
module attributes {stable_mosaic.version = 11 : i64} {
  func.func @_u_dot_v_kernel(%arg0: i32, %arg1: i32, %arg2: memref<32x128xf32, #tpu.memory_space<vmem>>, %arg3: memref<32x128xf32, #tpu.memory_space<vmem>>, %arg4: memref<1x128xf32, #tpu.memory_space<vmem>>, %arg5: memref<1x128xf32, #tpu.memory_space<vmem>>) attributes {dimension_semantics = [#tpu.dimension_semantics<parallel>, #tpu.dimension_semantics<arbitrary>], iteration_bounds = array<i64: 1, 1>, scalar_prefetch = 0 : i64, scratch_operands = 1 : i64, tpu.core_type = #tpu.core_type<tc>, window_params = [{transform_indices = @transform_0, window_bounds = array<i64: 32, 128>}, {transform_indices = @transform_1, window_bounds = array<i64: 32, 128>}, {transform_indices = @transform_2, window_bounds = array<i64: 1, 128>}]} {
    %c0_i32 = arith.constant 0 : i32
    %0 = arith.cmpi eq, %arg1, %c0_i32 : i32
    %1 = arith.extui %0 : i1 to i32
    %c0_i32_0 = arith.constant 0 : i32
    %2 = arith.cmpi ne, %1, %c0_i32_0 : i32
    scf.if %2 {
      %cst_10 = arith.constant 0.000000e+00 : f32
      %14 = vector.broadcast %cst_10 : f32 to vector<1x128xf32>
      %c0_11 = arith.constant 0 : index
      %c0_12 = arith.constant 0 : index
      %15 = vector.load %arg5[%c0_11, %c0_12] : memref<1x128xf32, #tpu.memory_space<vmem>>, vector<1x128xf32>
      tpu.vector_store %arg5[%c0_11, %c0_12], %14 {strides = array<i32>} : memref<1x128xf32, #tpu.memory_space<vmem>>, vector<1x128xf32>,
    } else {
    }
    %c0 = arith.constant 0 : index
    %c0_1 = arith.constant 0 : index
    %3 = vector.load %arg2[%c0, %c0_1] : memref<32x128xf32, #tpu.memory_space<vmem>>, vector<32x128xf32>
    %c0_2 = arith.constant 0 : index
    %c0_3 = arith.constant 0 : index
    %4 = vector.load %arg3[%c0_2, %c0_3] : memref<32x128xf32, #tpu.memory_space<vmem>>, vector<32x128xf32>
    %c0_4 = arith.constant 0 : index
    %c0_5 = arith.constant 0 : index
    %5 = vector.load %arg5[%c0_4, %c0_5] : memref<1x128xf32, #tpu.memory_space<vmem>>, vector<1x128xf32>
    %6 = arith.mulf %3, %4 : vector<32x128xf32>
    %cst = arith.constant dense<0.000000e+00> : vector<128xf32>
    %7 = vector.multi_reduction <add>, %6, %cst [0] : vector<32x128xf32> to vector<128xf32>
    %8 = vector.shape_cast %7 : vector<128xf32> to vector<1x128xf32>
    %9 = arith.addf %5, %8 : vector<1x128xf32>
    %c0_6 = arith.constant 0 : index
    %c0_7 = arith.constant 0 : index
    %10 = vector.load %arg5[%c0_6, %c0_7] : memref<1x128xf32, #tpu.memory_space<vmem>>, vector<1x128xf32>
    tpu.vector_store %arg5[%c0_6, %c0_7], %9 {strides = array<i32>} : memref<1x128xf32, #tpu.memory_space<vmem>>, vector<1x128xf32>,
    %c0_i32_8 = arith.constant 0 : i32
    %11 = arith.cmpi eq, %arg1, %c0_i32_8 : i32
    %12 = arith.extui %11 : i1 to i32
    %c0_i32_9 = arith.constant 0 : i32
    %13 = arith.cmpi ne, %12, %c0_i32_9 : i32
    scf.if %13 {
      %c0_10 = arith.constant 0 : index
      %c0_11 = arith.constant 0 : index
      %14 = vector.load %arg5[%c0_10, %c0_11] : memref<1x128xf32, #tpu.memory_space<vmem>>, vector<1x128xf32>
      %c0_12 = arith.constant 0 : index
      %c0_13 = arith.constant 0 : index
      %15 = vector.load %arg4[%c0_12, %c0_13] : memref<1x128xf32, #tpu.memory_space<vmem>>, vector<1x128xf32>
      tpu.vector_store %arg4[%c0_12, %c0_13], %14 {strides = array<i32>} : memref<1x128xf32, #tpu.memory_space<vmem>>, vector<1x128xf32>,
    } else {
    }
    return
  }
  func.func @transform_0(%arg0: i32, %arg1: i32) -> (i32, i32) {
    %c0_i32 = arith.constant 0 : i32
    return %arg1, %arg0 : i32, i32
  }
  func.func @transform_1(%arg0: i32, %arg1: i32) -> (i32, i32) {
    %c0_i32 = arith.constant 0 : i32
    return %arg1, %arg0 : i32, i32
  }
  func.func @transform_2(%arg0: i32, %arg1: i32) -> (i32, i32) {
    %c0_i32 = arith.constant 0 : i32
    %c0_i32_0 = arith.constant 0 : i32
    return %c0_i32, %arg0 : i32, i32
  }
}

</mosaic_0001>

<bundles_post_ra>
// kernel: tpu_custom_call.1
= control target key start
LH: loop header
LB: loop body
LE: loop exit
PB: predicated region body
PF: predicated region fallthrough
CT: control target
= control target key end

     0   :  { %7 = vsyncpa [#allocation4], 0  ;;  %s225_s0 = inlined_call_operand.hbm [shape: f32[32,128], index: 0, kind: input, shape index: {}]   ;;  %s226_s1 = inlined_call_operand.hbm [shape: f32[32,128], index: 1, kind: input, shape index: {}]   ;;  %s227_s2 = inlined_call_operand.hbm [shape: f32[1,128], index: 2, kind: output, shape index: {}]  }
   0x1   :  { %8 = vsyncpa [#allocation7], 0 }
   0x2   :  { %9 = vsyncpa [#allocation5], 0  ;;  %s168_s9 = smov [#allocation3]   ;;  %s96_s13 = scalar_lea.hbm %s225_s0, 512 }
   0x3   :  { %s15_s10 = sshll.u32 %s168_s9, 4  ;;  %p97_p0 = scmp.ne.s32.totalorder %s225_s0, %s96_s13  ;;  %s16_s10 = int_to_ptr.vmem [resolvable:$true] %s15_s10 }
   0x4   :  { %p100_p1 = scmp.lt.u32.totalorder %s96_s13, %s225_s0 }
   0x6   :  { %p102_p2 = pnand %p100_p1, %p97_p0 }
   0x8   :  { %105 = shalt.err (!%p102_p2)
}
   0x9   :  { %s106_s18 = scalar_lea.vmem %s16_s10, 512  ;;  %p111_p4 = scmp.lt.s32.totalorder %s16_s10, %s16_s10 }
   0xa   :  { %p107_p3 = scmp.ne.s32.totalorder %s16_s10, %s106_s18  ;;  %p112_p5 = scmp.lt.s32.totalorder %s106_s18, %s106_s18 }
   0xc   :  { %p113_p6 = por %p112_p5, %p111_p4 }
   0xe   :  { %p114_p7 = pnand %p113_p6, %p107_p3 }
  0x10   :  { %117 = shalt.err (!%p114_p7)
}
  0x11   :  { %s169_s19 = smov 128   ;;  %s170_s20 = smov 8  }
  0x12   :  { %21 = dma.hbm_to_vmem [thread:$0]  %s225_s0, 512, %s16_s10, [#allocation4], %s169_s19, %s169_s19, %s170_s20  }
  0x13   :  { %s171_s23 = smov [#allocation6]   ;;  %s118_s27 = scalar_lea.hbm %s226_s1, 512 }
  0x14   :  { %s27_s24 = sshll.u32 %s171_s23, 4  ;;  %p119_p8 = scmp.ne.s32.totalorder %s226_s1, %s118_s27  ;;  %s28_s24 = int_to_ptr.vmem [resolvable:$true] %s27_s24 }
  0x15   :  { %p122_p9 = scmp.lt.u32.totalorder %s118_s27, %s226_s1 }
  0x17   :  { %p124_p10 = pnand %p122_p9, %p119_p8 }
  0x19   :  { %127 = shalt.err (!%p124_p10)
}
  0x1a   :  { %s128_s4 = scalar_lea.vmem %s28_s24, 512  ;;  %p133_p12 = scmp.lt.s32.totalorder %s28_s24, %s28_s24 }
  0x1b   :  { %p129_p11 = scmp.ne.s32.totalorder %s28_s24, %s128_s4  ;;  %p134_p13 = scmp.lt.s32.totalorder %s128_s4, %s128_s4 }
  0x1d   :  { %p135_p0 = por %p134_p13, %p133_p12 }
  0x1f   :  { %p136_p1 = pnand %p135_p0, %p129_p11 }
  0x21   :  { %139 = shalt.err (!%p136_p1)
}
  0x22   :  { %33 = dma.hbm_to_vmem [thread:$0]  %s226_s1, 512, %s28_s24, [#allocation7], %s169_s19, %s169_s19, %s170_s20  }
  0x23   :  { %162 = dma.done.wait [#allocation4], 512  }
  0x24   :  { %163 = vsyncadd [#allocation4], 4294966784 }
  0x25   :  { %164 = dma.done.wait [#allocation7], 512  }
  0x26   :  { %165 = vsyncadd [#allocation7], 4294966784  ;;  %v172_v0 = vmov 0.0   ;;  %v45_v1 = vld [vmem:[#allocation3] sm:$0xff]  ;;  %v46_v2 = vld [vmem:[#allocation3 + $0x8] sm:$0xff]  ;;  %s173_s1 = smov [#allocation8]  }
  0x27   :  { %44 = vst [vmem:[#allocation2] sm:$0x1] %v172_v0  ;;  %v47_v3 = vld [vmem:[#allocation3 + $0x10] sm:$0xff]  ;;  %v48_v4 = vld [vmem:[#allocation3 + $0x18] sm:$0xff]  ;;  %v49_v5 = vld [vmem:[#allocation6] sm:$0xff]  ;;  %s80_s6 = sshll.u32 %s173_s1, 4  ;;  %s81_s6 = int_to_ptr.vmem [resolvable:$true] %s80_s6 }
  0x28   :  { %v50_v6 = vld [vmem:[#allocation6 + $0x8] sm:$0xff]  ;;  %v51_v7 = vld [vmem:[#allocation6 + $0x10] sm:$0xff]  ;;  %v52_v8 = vld [vmem:[#allocation6 + $0x18] sm:$0xff]  ;;  %v54_v9 = vmul.f32 %v49_v5, %v45_v1  ;;  %s140_s7 = scalar_lea.vmem %s81_s6, 16  ;;  %s144_s8 = scalar_lea.vmem %s81_s6, 32 }
  0x29   :  { %v55_v10 = vmul.f32 %v50_v6, %v46_v2  ;;  %v56_v11 = vmul.f32 %v51_v7, %v47_v3  ;;  %v57_v12 = vmul.f32 %v52_v8, %v48_v4  ;;  %p141_p2 = scmp.ne.s32.totalorder %s81_s6, %s140_s7  ;;  %p145_p3 = scmp.lt.s32.totalorder %s81_s6, %s81_s6 }
  0x2a   :  { %p146_p4 = scmp.lt.s32.totalorder %s144_s8, %s140_s7 }
  0x2b   :  { %v58_v13 = vadd.f32 %v55_v10, %v54_v9 }
  0x2c   :  { %p147_p5 = por %p146_p4, %p145_p3 }
  0x2d   :  { %v59_v14 = vadd.f32 %v58_v13, %v56_v11 }
  0x2e   :  { %v53_v21 = vld [vmem:[#allocation2] sm:$0x1]  ;;  %p148_p6 = pnand %p147_p5, %p141_p2 }
  0x2f   :  { %v60_v15 = vadd.f32 %v59_v14, %v57_v12 }
  0x31   :  { %v61_v16 = vrot.slane %v60_v15, 4 }
  0x33   :  { %v62_v17 = vadd.f32 %v61_v16, %v60_v15 }
  0x35   :  { %v63_v18 = vrot.slane %v62_v17, 2 }
  0x37   :  { %v64_v19 = vadd.f32 %v63_v18, %v62_v17 }
  0x39   :  { %v65_v20 = vrot.slane %v64_v19, 1 }
  0x3b   :  { %v66_v22 = vadd.f32 %v65_v20, %v64_v19 }
  0x3d   :  { %v67_v23 = vadd.f32 %v66_v22, %v53_v21 }
  0x3f   :  { %68 = vst [vmem:[#allocation2] sm:$0x1] %v67_v23 }
  0x46   :  { %v72_v24 = vld [vmem:[#allocation2] sm:$0x1] }
  0x47   :  { %73 = vst [vmem:[#allocation8] sm:$0x1] %v72_v24 }
  0x48   :  { %151 = shalt.err (!%p148_p6)
}
  0x49   :  { %s152_s11 = scalar_lea.hbm %s227_s2, 16 }
  0x4a   :  { %p153_p7 = scmp.ne.s32.totalorder %s227_s2, %s152_s11  ;;  %p156_p8 = scmp.lt.u32.totalorder %s152_s11, %s227_s2 }
  0x4c   :  { %p158_p9 = pnand %p156_p8, %p153_p7 }
  0x4e   :  { %161 = shalt.err (!%p158_p9)
}
  0x4f   :  { %83 = dma.vmem_to_hbm [thread:$0]  %s81_s6, 16, %s227_s2, [#allocation5]  }
  0x50   :  { %166 = dma.done.wait [#allocation5], 16  }
  0x51   :  { %167 = vsyncadd [#allocation5], 4294967280 }
  0x52   :  { %87 = vsyncpa [#allocation4], 1 }
  0x53   :  { %88 = vsyncpa [#allocation7], 1 }
  0x54   :  { %89 = vsyncpa [#allocation5], 1 }

</bundles_post_ra>
